<compile_context>
chip_gen: v6e
topology: v6e:2x2x1
jax: 0.10.0
libtpu: 0.0.40
codegen_flags: <defaults>
</compile_context>

<pallas_src>
import functools
import math

import jax
import jax.numpy as jnp
from jax import lax
from jax.experimental import pallas as pl
from jax.experimental.pallas import tpu as pltpu


def _pick_tile(dim, preferred, multiple):
    """Largest tile <= preferred that is a multiple of `multiple` and divides
    `dim` exactly; falls back to the full dim (always a legal block shape)."""
    if dim <= preferred:
        return dim
    t = preferred - (preferred % multiple)
    while t >= multiple:
        if dim % t == 0:
            return t
        t -= multiple
    return dim


# ---------------------------------------------------------------------------
# Kernel 1: fused Q/K/V linear projections  (y = x @ W_T + b, W_T is [in,out])
# ---------------------------------------------------------------------------
def _qkv_proj_kernel(x_ref, wq_ref, wk_ref, wv_ref, bq_ref, bk_ref, bv_ref,
                     q_ref, k_ref, v_ref):
    x = x_ref[...]                                    # [tm, H], input dtype (no upcast)
    q = jnp.dot(x, wq_ref[...], preferred_element_type=jnp.float32)
    k = jnp.dot(x, wk_ref[...], preferred_element_type=jnp.float32)
    v = jnp.dot(x, wv_ref[...], preferred_element_type=jnp.float32)
    q_ref[...] = (q + bq_ref[...]).astype(q_ref.dtype)   # bias blocks are (1, tn)
    k_ref[...] = (k + bk_ref[...]).astype(k_ref.dtype)
    v_ref[...] = (v + bv_ref[...]).astype(v_ref.dtype)


# ---------------------------------------------------------------------------
# Kernel 2: attention over a [tq, H] query tile, all heads per step
# ---------------------------------------------------------------------------
def _attention_kernel(q_ref, k_ref, v_ref, mask_ref, o_ref, *,
                      num_heads, head_dim, scale):
    mask = mask_ref[...]                              # [1, S] f32 additive key mask
    dn_qk = (((1,), (1,)), ((), ()))                  # contract head dim: Q @ K^T
    # Static unroll over heads: all slices are compile-time column windows of
    # the lane-dense [*, H] blocks, so no relayout / masked stores are needed.
    for h in range(num_heads):
        sl = slice(h * head_dim, (h + 1) * head_dim)
        q_h = q_ref[:, sl] * scale                    # scale q (tq x d), not scores (tq x S)
        k_h = k_ref[:, sl]
        v_h = v_ref[:, sl]
        scores = lax.dot_general(q_h, k_h, dn_qk,
                                 preferred_element_type=jnp.float32)  # [tq, S] f32
        scores = scores + mask
        # Numerically stable softmax, normalization deferred to after PV.
        m = jnp.max(scores, axis=-1, keepdims=True)
        p = jnp.exp(scores - m)                       # unnormalized probs (f32)
        l = jnp.sum(p, axis=-1, keepdims=True)        # row sums [tq, 1]
        # TODO(synk): attention_probs dropout omitted (eval-mode forward == identity).
        ctx = jnp.dot(p.astype(v_h.dtype), v_h,
                      preferred_element_type=jnp.float32)             # [tq, d] f32
        ctx = ctx * pl.reciprocal(l, approx=True)     # normalize small tile on the EUP
        o_ref[:, sl] = ctx.astype(o_ref.dtype)
    # TODO(synk): for very long sequences (S >= ~2048) add KV tiling with an
    # online-softmax accumulator instead of the full [tq, S] scores tile.


# ---------------------------------------------------------------------------
# Wrapper
# ---------------------------------------------------------------------------
def bert_self_attention(hidden_states, attention_mask,
                        wq, bq, wk, bk, wv, bv, num_attention_heads):
    """hidden_states: [B, S, H]; attention_mask: additive, [B, 1, 1, S] or [B, S]
    (per-key mask); wq/wk/wv: [H, H] PyTorch [out, in]; bq/bk/bv: [H]."""
    B, S, H = hidden_states.shape
    nh = num_attention_heads
    d = H // nh
    M = B * S
    dtype = hidden_states.dtype

    x2 = hidden_states.reshape(M, H)
    # One-time static relayout: PyTorch [out, in] -> [in, out]. Weights are
    # constants, so this costs nothing in steady state and removes the
    # per-tile trans_b / relayout from the hot loop.
    wqt, wkt, wvt = wq.T, wk.T, wv.T
    bq2, bk2, bv2 = bq.reshape(1, H), bk.reshape(1, H), bv.reshape(1, H)

    # Row tiles: multiple of 16 sublanes for packed dtypes, 8 otherwise.
    row_mult = 16 if dtype in (jnp.bfloat16, jnp.float16) else 8
    tm = _pick_tile(M, 512, row_mult)
    tn = _pick_tile(H, 512, 128)        # lane-dense output-column panels

    q2, k2, v2 = pl.pallas_call(
        _qkv_proj_kernel,
        out_shape=(jax.ShapeDtypeStruct((M, H), dtype),) * 3,
        grid_spec=pltpu.PrefetchScalarGridSpec(
            num_scalar_prefetch=0,
            # Output-column panels OUTER, row panels INNER -> the 3 weight
            # panels keep the same block index across the inner loop and are
            # loaded from HBM once per panel; only x and the outputs stream.
            grid=(H // tn, M // tm),
            in_specs=[
                pl.BlockSpec((tm, H), lambda j, i: (i, 0)),   # x row panel (streamed)
                pl.BlockSpec((H, tn), lambda j, i: (0, j)),   # Wq^T panel (resident over i)
                pl.BlockSpec((H, tn), lambda j, i: (0, j)),   # Wk^T
                pl.BlockSpec((H, tn), lambda j, i: (0, j)),   # Wv^T
                pl.BlockSpec((1, tn), lambda j, i: (0, j)),   # bq tile
                pl.BlockSpec((1, tn), lambda j, i: (0, j)),   # bk tile
                pl.BlockSpec((1, tn), lambda j, i: (0, j)),   # bv tile
            ],
            out_specs=(pl.BlockSpec((tm, tn), lambda j, i: (i, j)),) * 3,
        ),
        compiler_params=pltpu.CompilerParams(
            dimension_semantics=("parallel", "parallel")),
    )(x2, wqt, wkt, wvt, bq2, bk2, bv2)

    # Free metadata reshapes only (leading-dim split) -- no relayout passes.
    q3 = q2.reshape(B, S, H)
    k3 = k2.reshape(B, S, H)
    v3 = v2.reshape(B, S, H)

    # Standard BERT additive mask [B, 1, 1, S] -> [B, S] (per-key mask).
    mask2 = attention_mask.reshape(B, S).astype(jnp.float32)

    tq = _pick_tile(S, 256, row_mult)   # query tile bounds the [tq, S] scores
    scale = 1.0 / math.sqrt(d)

    ctx = pl.pallas_call(
        functools.partial(_attention_kernel,
                          num_heads=nh, head_dim=d, scale=scale),
        out_shape=jax.ShapeDtypeStruct((B, S, H), dtype),
        grid_spec=pltpu.PrefetchScalarGridSpec(
            num_scalar_prefetch=0,
            grid=(B, S // tq),
            in_specs=[
                pl.BlockSpec((None, tq, H), lambda b, qi: (b, qi, 0)),  # Q tile
                pl.BlockSpec((None, S, H), lambda b, qi: (b, 0, 0)),    # K (resident per b)
                pl.BlockSpec((None, S, H), lambda b, qi: (b, 0, 0)),    # V (resident per b)
                pl.BlockSpec((1, S), lambda b, qi: (b, 0)),             # mask
            ],
            out_specs=pl.BlockSpec((None, tq, H), lambda b, qi: (b, qi, 0)),
        ),
        compiler_params=pltpu.CompilerParams(
            dimension_semantics=("parallel", "parallel")),
    )(q3, k3, v3, mask2)

    # Output is already [B, S, H] == permute(0,2,1,3).view(B, S, H) of the
    # per-head context: no final relayout pass needed.
    return ctx


if __name__ == "__main__":
    # Small shapes consistent with the module: batch=2, seq=8, hidden=32, heads=4.
    B, S, H, NH = 2, 8, 32, 4
    D = H // NH
    key = jax.random.PRNGKey(0)
    ks = jax.random.split(key, 8)

    x = jax.random.normal(ks[0], (B, S, H), dtype=jnp.float32)
    bound = 1.0 / math.sqrt(H)
    wq = jax.random.uniform(ks[1], (H, H), minval=-bound, maxval=bound, dtype=jnp.float32)
    wk = jax.random.uniform(ks[2], (H, H), minval=-bound, maxval=bound, dtype=jnp.float32)
    wv = jax.random.uniform(ks[3], (H, H), minval=-bound, maxval=bound, dtype=jnp.float32)
    bq = jax.random.uniform(ks[4], (H,), minval=-bound, maxval=bound, dtype=jnp.float32)
    bk = jax.random.uniform(ks[5], (H,), minval=-bound, maxval=bound, dtype=jnp.float32)
    bv = jax.random.uniform(ks[6], (H,), minval=-bound, maxval=bound, dtype=jnp.float32)

    # Additive attention mask [B, 1, 1, S]: 0 = keep, -10000 = masked.
    keep = (jax.random.uniform(ks[7], (B, S)) > 0.2).astype(jnp.float32)
    attn_mask = ((1.0 - keep) * -10000.0).reshape(B, 1, 1, S)

    out = bert_self_attention(x, attn_mask, wq, bq, wk, bk, wv, bv, NH)
    out = jax.block_until_ready(out)

    # Pure-JAX reference (eval mode: dropout is identity).
    def ref_fn(x):
        q = x @ wq.T + bq
        k = x @ wk.T + bk
        v = x @ wv.T + bv
        split = lambda t: t.reshape(B, S, NH, D).transpose(0, 2, 1, 3)
        q, k, v = split(q), split(k), split(v)
        scores = jnp.einsum("bhqd,bhkd->bhqk", q, k) / math.sqrt(D)
        scores = scores + attn_mask
        probs = jax.nn.softmax(scores, axis=-1)
        ctx = jnp.einsum("bhqk,bhkd->bhqd", probs, v)
        return ctx.transpose(0, 2, 1, 3).reshape(B, S, H)

    ref = ref_fn(x)
    assert out.shape == (B, S, H)
    # Tolerance loosened vs f32-exact because the kernel uses the EUP
    # approximate reciprocal for the softmax normalization (and supports bf16
    # operands in production).
    assert jnp.allclose(out, ref, atol=1e-2, rtol=1e-2), float(jnp.max(jnp.abs(out - ref)))

    print("KERNEL_OK")
</pallas_src>

<mosaic_0001>
module attributes {stable_mosaic.version = 11 : i64} {
  func.func @_qkv_proj_kernel(%arg0: i32, %arg1: i32, %arg2: memref<16x32xf32, #tpu.memory_space<vmem>>, %arg3: memref<32x32xf32, #tpu.memory_space<vmem>>, %arg4: memref<32x32xf32, #tpu.memory_space<vmem>>, %arg5: memref<32x32xf32, #tpu.memory_space<vmem>>, %arg6: memref<1x32xf32, #tpu.memory_space<vmem>>, %arg7: memref<1x32xf32, #tpu.memory_space<vmem>>, %arg8: memref<1x32xf32, #tpu.memory_space<vmem>>, %arg9: memref<16x32xf32, #tpu.memory_space<vmem>>, %arg10: memref<16x32xf32, #tpu.memory_space<vmem>>, %arg11: memref<16x32xf32, #tpu.memory_space<vmem>>) attributes {dimension_semantics = [#tpu.dimension_semantics<parallel>, #tpu.dimension_semantics<parallel>], iteration_bounds = array<i64: 1, 1>, scalar_prefetch = 0 : i64, scratch_operands = 0 : i64, tpu.core_type = #tpu.core_type<tc>, window_params = [{transform_indices = @transform_0, window_bounds = array<i64: 16, 32>}, {transform_indices = @transform_1, window_bounds = array<i64: 32, 32>}, {transform_indices = @transform_2, window_bounds = array<i64: 32, 32>}, {transform_indices = @transform_3, window_bounds = array<i64: 32, 32>}, {transform_indices = @transform_4, window_bounds = array<i64: 1, 32>}, {transform_indices = @transform_5, window_bounds = array<i64: 1, 32>}, {transform_indices = @transform_6, window_bounds = array<i64: 1, 32>}, {transform_indices = @transform_7, window_bounds = array<i64: 16, 32>}, {transform_indices = @transform_8, window_bounds = array<i64: 16, 32>}, {transform_indices = @transform_9, window_bounds = array<i64: 16, 32>}]} {
    %c0 = arith.constant 0 : index
    %c0_0 = arith.constant 0 : index
    %0 = vector.load %arg2[%c0, %c0_0] : memref<16x32xf32, #tpu.memory_space<vmem>>, vector<16x32xf32>
    %c0_1 = arith.constant 0 : index
    %c0_2 = arith.constant 0 : index
    %1 = vector.load %arg3[%c0_1, %c0_2] : memref<32x32xf32, #tpu.memory_space<vmem>>, vector<32x32xf32>
    %cst = arith.constant dense<0.000000e+00> : vector<16x32xf32>
    %2 = tpu.matmul %0, %1, %cst {dimension_numbers = #tpu.dot_dimension_numbers<[1], [0], [0], [1], [0, 0, 1, 1], [], []>} : vector<16x32xf32>, vector<32x32xf32>, vector<16x32xf32> -> vector<16x32xf32>
    %c0_3 = arith.constant 0 : index
    %c0_4 = arith.constant 0 : index
    %3 = vector.load %arg4[%c0_3, %c0_4] : memref<32x32xf32, #tpu.memory_space<vmem>>, vector<32x32xf32>
    %cst_5 = arith.constant dense<0.000000e+00> : vector<16x32xf32>
    %4 = tpu.matmul %0, %3, %cst_5 {dimension_numbers = #tpu.dot_dimension_numbers<[1], [0], [0], [1], [0, 0, 1, 1], [], []>} : vector<16x32xf32>, vector<32x32xf32>, vector<16x32xf32> -> vector<16x32xf32>
    %c0_6 = arith.constant 0 : index
    %c0_7 = arith.constant 0 : index
    %5 = vector.load %arg5[%c0_6, %c0_7] : memref<32x32xf32, #tpu.memory_space<vmem>>, vector<32x32xf32>
    %cst_8 = arith.constant dense<0.000000e+00> : vector<16x32xf32>
    %6 = tpu.matmul %0, %5, %cst_8 {dimension_numbers = #tpu.dot_dimension_numbers<[1], [0], [0], [1], [0, 0, 1, 1], [], []>} : vector<16x32xf32>, vector<32x32xf32>, vector<16x32xf32> -> vector<16x32xf32>
    %c0_9 = arith.constant 0 : index
    %c0_10 = arith.constant 0 : index
    %7 = vector.load %arg6[%c0_9, %c0_10] : memref<1x32xf32, #tpu.memory_space<vmem>>, vector<1x32xf32>
    %8 = vector.broadcast %7 : vector<1x32xf32> to vector<16x32xf32>
    %9 = arith.addf %2, %8 : vector<16x32xf32>
    %c0_11 = arith.constant 0 : index
    %c0_12 = arith.constant 0 : index
    %10 = vector.load %arg9[%c0_11, %c0_12] : memref<16x32xf32, #tpu.memory_space<vmem>>, vector<16x32xf32>
    tpu.vector_store %arg9[%c0_11, %c0_12], %9 {strides = array<i32>} : memref<16x32xf32, #tpu.memory_space<vmem>>, vector<16x32xf32>,
    %c0_13 = arith.constant 0 : index
    %c0_14 = arith.constant 0 : index
    %11 = vector.load %arg7[%c0_13, %c0_14] : memref<1x32xf32, #tpu.memory_space<vmem>>, vector<1x32xf32>
    %12 = vector.broadcast %11 : vector<1x32xf32> to vector<16x32xf32>
    %13 = arith.addf %4, %12 : vector<16x32xf32>
    %c0_15 = arith.constant 0 : index
    %c0_16 = arith.constant 0 : index
    %14 = vector.load %arg10[%c0_15, %c0_16] : memref<16x32xf32, #tpu.memory_space<vmem>>, vector<16x32xf32>
    tpu.vector_store %arg10[%c0_15, %c0_16], %13 {strides = array<i32>} : memref<16x32xf32, #tpu.memory_space<vmem>>, vector<16x32xf32>,
    %c0_17 = arith.constant 0 : index
    %c0_18 = arith.constant 0 : index
    %15 = vector.load %arg8[%c0_17, %c0_18] : memref<1x32xf32, #tpu.memory_space<vmem>>, vector<1x32xf32>
    %16 = vector.broadcast %15 : vector<1x32xf32> to vector<16x32xf32>
    %17 = arith.addf %6, %16 : vector<16x32xf32>
    %c0_19 = arith.constant 0 : index
    %c0_20 = arith.constant 0 : index
    %18 = vector.load %arg11[%c0_19, %c0_20] : memref<16x32xf32, #tpu.memory_space<vmem>>, vector<16x32xf32>
    tpu.vector_store %arg11[%c0_19, %c0_20], %17 {strides = array<i32>} : memref<16x32xf32, #tpu.memory_space<vmem>>, vector<16x32xf32>,
    return
  }
  func.func @transform_0(%arg0: i32, %arg1: i32) -> (i32, i32) {
    %c0_i32 = arith.constant 0 : i32
    %c0_i32_0 = arith.constant 0 : i32
    return %arg1, %c0_i32 : i32, i32
  }
  func.func @transform_1(%arg0: i32, %arg1: i32) -> (i32, i32) {
    %c0_i32 = arith.constant 0 : i32
    %c0_i32_0 = arith.constant 0 : i32
    return %c0_i32, %arg0 : i32, i32
  }
  func.func @transform_2(%arg0: i32, %arg1: i32) -> (i32, i32) {
    %c0_i32 = arith.constant 0 : i32
    %c0_i32_0 = arith.constant 0 : i32
    return %c0_i32, %arg0 : i32, i32
  }
  func.func @transform_3(%arg0: i32, %arg1: i32) -> (i32, i32) {
    %c0_i32 = arith.constant 0 : i32
    %c0_i32_0 = arith.constant 0 : i32
    return %c0_i32, %arg0 : i32, i32
  }
  func.func @transform_4(%arg0: i32, %arg1: i32) -> (i32, i32) {
    %c0_i32 = arith.constant 0 : i32
    %c0_i32_0 = arith.constant 0 : i32
    return %c0_i32, %arg0 : i32, i32
  }
  func.func @transform_5(%arg0: i32, %arg1: i32) -> (i32, i32) {
    %c0_i32 = arith.constant 0 : i32
    %c0_i32_0 = arith.constant 0 : i32
    return %c0_i32, %arg0 : i32, i32
  }
  func.func @transform_6(%arg0: i32, %arg1: i32) -> (i32, i32) {
    %c0_i32 = arith.constant 0 : i32
    %c0_i32_0 = arith.constant 0 : i32
    return %c0_i32, %arg0 : i32, i32
  }
  func.func @transform_7(%arg0: i32, %arg1: i32) -> (i32, i32) {
    %c0_i32 = arith.constant 0 : i32
    return %arg1, %arg0 : i32, i32
  }
  func.func @transform_8(%arg0: i32, %arg1: i32) -> (i32, i32) {
    %c0_i32 = arith.constant 0 : i32
    return %arg1, %arg0 : i32, i32
  }
  func.func @transform_9(%arg0: i32, %arg1: i32) -> (i32, i32) {
    %c0_i32 = arith.constant 0 : i32
    return %arg1, %arg0 : i32, i32
  }
}

</mosaic_0001>

<bundles_post_ra>
// kernel: tpu_custom_call.1
= control target key start
LH: loop header
LB: loop body
LE: loop exit
PB: predicated region body
PF: predicated region fallthrough
CT: control target
= control target key end

     0   :  { %15 = vsyncpa [#allocation3], 0  ;;  %s750_s0 = inlined_call_operand.hbm [shape: f32[16,32], index: 0, kind: input, shape index: {}]   ;;  %s751_s1 = inlined_call_operand.hbm [shape: f32[32,32], index: 1, kind: input, shape index: {}]   ;;  %s752_s2 = inlined_call_operand.hbm [shape: f32[32,32], index: 2, kind: input, shape index: {}]   ;;  %s753_s3 = inlined_call_operand.hbm [shape: f32[32,32], index: 3, kind: input, shape index: {}]   ;;  %s754_s4 = inlined_call_operand.vmem [shape: f32[1,32], index: 4, kind: input, shape index: {}]   ;;  %s755_s5 = inlined_call_operand.vmem [shape: f32[1,32], index: 5, kind: input, shape index: {}]   ;;  %s756_s6 = inlined_call_operand.vmem [shape: f32[1,32], index: 6, kind: input, shape index: {}]   ;;  %s757_s7 = inlined_call_operand.hbm [shape: f32[16,32], index: 7, kind: output, shape index: {0}]   ;;  %s758_s8 = inlined_call_operand.hbm [shape: f32[16,32], index: 8, kind: output, shape index: {1}]   ;;  %s759_s9 = inlined_call_operand.hbm [shape: f32[16,32], index: 9, kind: output, shape index: {2}]  }
   0x1   :  { %16 = vsyncpa [#allocation6], 0 }
   0x2   :  { %17 = vsyncpa [#allocation9], 0 }
   0x3   :  { %18 = vsyncpa [#allocation4], 0 }
   0x4   :  { %19 = vsyncpa [#allocation12], 0  ;;  %s628_s30 = smov [#allocation5]   ;;  %s629_s11 = smov [#allocation2]  }
   0x5   :  { %s37_s10 = sshll.u32 %s628_s30, 4  ;;  %s25_s12 = sshll.u32 %s629_s11, 4  ;;  %s38_s10 = int_to_ptr.vmem [resolvable:$true] %s37_s10  ;;  %s26_s12 = int_to_ptr.vmem [resolvable:$true] %s25_s12 }
   0x6   :  { %s486_s13 = scalar_lea.vmem %s38_s10, 512  ;;  %p491_p1 = scmp.lt.s32.totalorder %s38_s10, %s38_s10 }
   0x7   :  { %p487_p0 = scmp.ne.s32.totalorder %s38_s10, %s486_s13  ;;  %p492_p2 = scmp.lt.s32.totalorder %s486_s13, %s486_s13 }
   0x9   :  { %p493_p3 = por %p492_p2, %p491_p1 }
   0xb   :  { %p494_p4 = pnand %p493_p3, %p487_p0 }
   0xd   :  { %497 = shalt.err (!%p494_p4)
}
   0xe   :  { %s630_s14 = smov 128   ;;  %s631_s15 = smov 8  }
   0xf   :  { %43 = dma.hbm_to_vmem [thread:$0]  %s751_s1, 512, %s38_s10, [#allocation6], %s630_s14, %s630_s14, %s631_s15  }
  0x10   :  { %s506_s18 = scalar_lea.vmem %s26_s12, 256  ;;  %p511_p6 = scmp.lt.s32.totalorder %s26_s12, %s26_s12 }
  0x11   :  { %p507_p5 = scmp.ne.s32.totalorder %s26_s12, %s506_s18  ;;  %p512_p7 = scmp.lt.s32.totalorder %s506_s18, %s506_s18 }
  0x13   :  { %p513_p8 = por %p512_p7, %p511_p6 }
  0x15   :  { %p514_p9 = pnand %p513_p8, %p507_p5 }
  0x17   :  { %517 = shalt.err (!%p514_p9)
}
  0x18   :  { %31 = dma.hbm_to_vmem [thread:$0]  %s750_s0, 256, %s26_s12, [#allocation3], %s630_s14, %s630_s14, %s631_s15  }
  0x19   :  { %s632_s21 = smov [#allocation7]   ;;  %s633_s23 = smov [#allocation8]  }
  0x1a   :  { %s49_s22 = sshll.u32 %s632_s21, 4  ;;  %s61_s24 = sshll.u32 %s633_s23, 4  ;;  %s50_s22 = int_to_ptr.vmem [resolvable:$true] %s49_s22  ;;  %s62_s24 = int_to_ptr.vmem [resolvable:$true] %s61_s24 }
  0x1b   :  { %s526_s1 = scalar_lea.vmem %s50_s22, 512  ;;  %p531_p11 = scmp.lt.s32.totalorder %s50_s22, %s50_s22 }
  0x1c   :  { %p527_p10 = scmp.ne.s32.totalorder %s50_s22, %s526_s1  ;;  %p532_p12 = scmp.lt.s32.totalorder %s526_s1, %s526_s1 }
  0x1e   :  { %p533_p13 = por %p532_p12, %p531_p11 }
  0x20   :  { %p534_p0 = pnand %p533_p13, %p527_p10 }
  0x22   :  { %537 = shalt.err (!%p534_p0)
}
  0x23   :  { %55 = dma.hbm_to_vmem [thread:$0]  %s752_s2, 512, %s50_s22, [#allocation6], %s630_s14, %s630_s14, %s631_s15  }
  0x24   :  { %s546_s0 = scalar_lea.vmem %s62_s24, 512  ;;  %p551_p2 = scmp.lt.s32.totalorder %s62_s24, %s62_s24 }
  0x25   :  { %p547_p1 = scmp.ne.s32.totalorder %s62_s24, %s546_s0  ;;  %p552_p3 = scmp.lt.s32.totalorder %s546_s0, %s546_s0 }
  0x27   :  { %p553_p4 = por %p552_p3, %p551_p2 }
  0x29   :  { %p554_p5 = pnand %p553_p4, %p547_p1 }
  0x2b   :  { %557 = shalt.err (!%p554_p5)
}
  0x2c   :  { %67 = dma.hbm_to_vmem [thread:$0]  %s753_s3, 512, %s62_s24, [#allocation9], %s630_s14, %s630_s14, %s631_s15  }
  0x2d   :  { %618 = dma.done.wait [#allocation3], 256  }
  0x2e   :  { %619 = vsyncadd [#allocation3], 4294967040 }
  0x2f   :  { %620 = dma.done.wait [#allocation6], 1024  }
  0x30   :  { %621 = vsyncadd [#allocation6], 4294966272 }
  0x31   :  { %622 = dma.done.wait [#allocation9], 512  }
  0x32   :  { %623 = vsyncadd [#allocation9], 4294966784  ;;  %v91_v0 = vld [vmem:[#allocation5 + $0x18] sm:$0xff]  ;;  %v90_v1 = vld [vmem:[#allocation5 + $0x10] sm:$0xff]  ;;  %vm107_vm0 = vcmask 261120   ;;  %s634_s29 = smov [#allocation10]  }
  0x33   :  { %436 = vmatprep.subr.mxu0 %v91_v0  ;;  %v95_v2 = vld [vmem:[#allocation7 + $0x18] sm:$0xff]  ;;  %v86_v3 = vld [vmem:[#allocation2] sm:$0xff]  ;;  %v89_v4 = vld [vmem:[#allocation5 + $0x8] sm:$0xff]  ;;  %s364_s30 = sshll.u32 %s634_s29, 4  ;;  %s635_s12 = smov [#allocation11]   ;;  %s365_s30 = int_to_ptr.vmem [resolvable:$true] %s364_s30 }
  0x34   :  { %437 = vmatpush3.msra.mxu0 %v91_v0  ;;  %447 = vmatprep.subr.mxu1 %v95_v2  ;;  %v94_v5 = vld [vmem:[#allocation7 + $0x10] sm:$0xff]  ;;  %v88_v6 = vld [vmem:[#allocation5] sm:$0xff]  ;;  %v93_v7 = vld [vmem:[#allocation7 + $0x8] sm:$0xff]  ;;  %s376_s13 = sshll.u32 %s635_s12, 4  ;;  %s558_s17 = scalar_lea.vmem %s365_s30, 256  ;;  %s377_s13 = int_to_ptr.vmem [resolvable:$true] %s376_s13 }
  0x35   :  { %438 = vmatprep.subr.mxu0 %v90_v1  ;;  %448 = vmatpush3.msra.mxu1 %v95_v2  ;;  %v87_v8 = vld [vmem:[#allocation2 + $0x8] sm:$0xff]  ;;  %v92_v10 = vld [vmem:[#allocation7] sm:$0xff]  ;;  %v98_v11 = vld [vmem:[#allocation8 + $0x10] sm:$0xff]  ;;  %p559_p6 = scmp.ne.s32.totalorder %s365_s30, %s558_s17  ;;  %p563_p7 = scmp.lt.s32.totalorder %s365_s30, %s365_s30 }
  0x36   :  { %439 = vmatpush3.msra.mxu0 %v90_v1  ;;  %444 = vmatprep.mubr.msk.f32.mxu0 %vm107_vm0, %v86_v3  ;;  %v99_v9 = vld [vmem:[#allocation8 + $0x18] sm:$0xff]  ;;  %v97_v12 = vld [vmem:[#allocation8 + $0x8] sm:$0xff]  ;;  %v96_v13 = vld [vmem:[#allocation8] sm:$0xff]  ;;  %p564_p8 = scmp.lt.s32.totalorder %s558_s17, %s558_s17 }
  0x37   :  { %440 = vmatprep.subr.mxu0 %v89_v4  ;;  %449 = vmatprep.subr.mxu1 %v94_v5  ;;  %v409_v14 = vld [vmem:[%s754_s4] ss:$0 sm:$0xff] }
  0x38   :  { %441 = vmatpush3.msra.mxu0 %v89_v4  ;;  %450 = vmatpush3.msra.mxu1 %v94_v5  ;;  %v412_v18 = vld [vmem:[%s755_s5] ss:$0 sm:$0xff]  ;;  %p565_p9 = por %p564_p8, %p563_p7 }
  0x39   :  { %442 = vmatprep.subr.mxu0 %v88_v6  ;;  %451 = vmatprep.subr.mxu1 %v93_v7  ;;  %v415_v22 = vld [vmem:[%s756_s6] ss:$0 sm:$0xff] }
  0x3a   :  { %443 = vmatpush3.msra.mxu0 %v88_v6  ;;  %452 = vmatpush3.msra.mxu1 %v93_v7  ;;  %p566_p10 = pnand %p565_p9, %p559_p6 }
  0x3b   :  { %445 = vmatmul.mubr.msk.f32.vlgmr.msra.gmra.mxu0 %vm107_vm0, %v87_v8  ;;  %458 = vmatprep.subr.mxu0 %v99_v9 }
  0x3c   :  { %459 = vmatpush3.msra.mxu0 %v99_v9  ;;  %453 = vmatprep.subr.mxu1 %v92_v10 }
  0x3d   :  { %460 = vmatprep.subr.mxu0 %v98_v11  ;;  %454 = vmatpush3.msra.mxu1 %v92_v10 }
  0x3e   :  { %461 = vmatpush3.msra.mxu0 %v98_v11  ;;  %455 = vmatprep.mubr.msk.f32.mxu1 %vm107_vm0, %v86_v3 }
  0x3f   :  { %462 = vmatprep.subr.mxu0 %v97_v12  ;;  %456 = vmatmul.mubr.msk.f32.vlgmr.msra.gmra.mxu1 %vm107_vm0, %v87_v8 }
  0x40   :  { %463 = vmatpush3.msra.mxu0 %v97_v12  ;;  %466 = vmatprep.mubr.msk.f32.mxu0 %vm107_vm0, %v86_v3 }
  0x41   :  { %464 = vmatprep.subr.mxu0 %v96_v13 }
  0x42   :  { %465 = vmatpush3.msra.mxu0 %v96_v13 }
  0x43   :  { %467 = vmatmul.mubr.msk.f32.vlgmr.msra.gmra.mxu0 %vm107_vm0, %v87_v8 }
  0xfb   :  { %v446_v15 = vpop.f32.mrf.mxu0 }
  0xfc   :  { %v186_v16 = vadd.f32 %v446_v15, %v409_v14 }
  0xfd   :  { %v180_v17 = vpop.f32.mrf.mxu0 }
  0xfe   :  { %190 = vst.msk [vmem:[#allocation10 + $0x8] sm:$0xff] %vm107_vm0, %v186_v16  ;;  %v181_v19 = vadd.f32 %v409_v14, %v180_v17 }
  0xff   :  { %v457_v20 = vpop.f32.mrf.mxu1 }
 0x100   :  { %189 = vst.msk [vmem:[#allocation10] sm:$0xff] %vm107_vm0, %v181_v19  ;;  %v270_v21 = vadd.f32 %v457_v20, %v412_v18 }
 0x101   :  { %v264_v23 = vpop.f32.mrf.mxu1 }
 0x102   :  { %569 = shalt.err (!%p566_p10)
}
 0x103   :  { %370 = dma.vmem_to_hbm [thread:$0]  %s365_s30, 256, %s757_s7, [#allocation4], %s630_s14, %s630_s14, %s631_s15   ;;  %274 = vst.msk [vmem:[#allocation11 + $0x8] sm:$0xff] %vm107_vm0, %v270_v21  ;;  %v265_v24 = vadd.f32 %v412_v18, %v264_v23  ;;  %v468_v25 = vpop.f32.mrf.mxu0 }
 0x104   :  { %s636_s6 = smov [#allocation13]   ;;  %v354_v26 = vadd.f32 %v468_v25, %v415_v22  ;;  %s578_s20 = scalar_lea.vmem %s377_s13, 256 }
 0x105   :  { %s388_s19 = sshll.u32 %s636_s6, 4  ;;  %273 = vst.msk [vmem:[#allocation11] sm:$0xff] %vm107_vm0, %v265_v24  ;;  %v348_v27 = vpop.f32.mrf.mxu0  ;;  %p579_p11 = scmp.ne.s32.totalorder %s377_s13, %s578_s20  ;;  %s389_s19 = int_to_ptr.vmem [resolvable:$true] %s388_s19 }
 0x106   :  { %p583_p12 = scmp.lt.s32.totalorder %s377_s13, %s377_s13  ;;  %p584_p13 = scmp.lt.s32.totalorder %s578_s20, %s578_s20 }
 0x108   :  { %p585_p0 = por %p584_p13, %p583_p12 }
 0x10a   :  { %p586_p1 = pnand %p585_p0, %p579_p11 }
 0x10c   :  { %589 = shalt.err (!%p586_p1)
}
 0x10d   :  { %382 = dma.vmem_to_hbm [thread:$0]  %s377_s13, 256, %s758_s8, [#allocation12], %s630_s14, %s630_s14, %s631_s15   ;;  %358 = vst.msk [vmem:[#allocation13 + $0x8] sm:$0xff] %vm107_vm0, %v354_v26  ;;  %v349_v28 = vadd.f32 %v415_v22, %v348_v27 }
 0x10e   :  { %s598_s22 = scalar_lea.vmem %s389_s19, 256  ;;  %p603_p3 = scmp.lt.s32.totalorder %s389_s19, %s389_s19 }
 0x10f   :  { %357 = vst.msk [vmem:[#allocation13] sm:$0xff] %vm107_vm0, %v349_v28  ;;  %p599_p2 = scmp.ne.s32.totalorder %s389_s19, %s598_s22  ;;  %p604_p4 = scmp.lt.s32.totalorder %s598_s22, %s598_s22 }
 0x111   :  { %p605_p5 = por %p604_p4, %p603_p3 }
 0x113   :  { %p606_p6 = pnand %p605_p5, %p599_p2 }
 0x115   :  { %609 = shalt.err (!%p606_p6)
}
 0x116   :  { %394 = dma.vmem_to_hbm [thread:$0]  %s389_s19, 256, %s759_s9, [#allocation12], %s630_s14, %s630_s14, %s631_s15  }
 0x117   :  { %624 = dma.done.wait [#allocation4], 256  }
 0x118   :  { %625 = vsyncadd [#allocation4], 4294967040 }
 0x119   :  { %626 = dma.done.wait [#allocation12], 512  }
 0x11a   :  { %627 = vsyncadd [#allocation12], 4294966784 }
 0x11b   :  { %404 = vsyncpa [#allocation3], 1 }
 0x11c   :  { %405 = vsyncpa [#allocation6], 1 }
 0x11d   :  { %406 = vsyncpa [#allocation9], 1 }
 0x11e   :  { %407 = vsyncpa [#allocation4], 1 }
 0x11f   :  { %408 = vsyncpa [#allocation12], 1 }

</bundles_post_ra>
